<compile_context>
chip_gen: v5e
topology: v5e:2x2
jax: 0.10.0
libtpu: 0.0.40
codegen_flags: <defaults>
</compile_context>

<pallas_src>
import functools
import jax
import jax.numpy as jnp
from jax.experimental import pallas as pl
from jax.experimental.pallas import tpu as pltpu


VMEM_LIMIT = 32 * 1024 * 1024  # explicit scoped-VMEM budget, safe on v5e/v6e/v7x


# ----------------------------- tile helpers ----------------------------------

def _tile_rows(m, pref=256):
    """Row (sublane) tile: multiple of 8 that divides m, else full m."""
    if m <= pref:
        return m
    t = (pref // 8) * 8
    while t >= 8:
        if m % t == 0:
            return t
        t -= 8
    return m


def _tile_lanes(n, pref=512):
    """Lane tile: multiple of 128 that divides n, else full n."""
    if n <= pref:
        return n
    t = (pref // 128) * 128
    while t >= 128:
        if n % t == 0:
            return t
        t -= 128
    return n


# ----------------------------- Pallas kernels --------------------------------

def _ln_linear_kernel(x_ref, g_ref, b_ref, w_ref, bias_ref, o_ref):
    """out = LayerNorm(x) @ W + bias   (LN in f32, matmul in bf16 on the MXU)."""
    x = x_ref[...]
    mean = jnp.mean(x, axis=-1, keepdims=True)
    var = jnp.mean(jnp.square(x - mean), axis=-1, keepdims=True)
    xn = (x - mean) * jax.lax.rsqrt(var + 1e-5) * g_ref[...] + b_ref[...]
    o_ref[...] = (jnp.dot(xn.astype(jnp.bfloat16), w_ref[...],
                          preferred_element_type=jnp.float32) + bias_ref[...])


def _linear_residual_kernel(h_ref, w_ref, b_ref, res_ref, o_ref):
    """out = residual + (h @ W + bias)  -- residual add fused into the store."""
    o_ref[...] = (jnp.dot(h_ref[...].astype(jnp.bfloat16), w_ref[...],
                          preferred_element_type=jnp.float32)
                  + b_ref[...] + res_ref[...])


def _mlp_block_kernel(x_ref, g_ref, b_ref, fcw_ref, fcb_ref, pw_ref, pb_ref, o_ref):
    """out = x + proj(QuickGELU(fc(LayerNorm(x)))).

    The (tm, 4D) intermediate lives only in registers/VMEM; it is never
    materialized in HBM.
    """
    x = x_ref[...]
    mean = jnp.mean(x, axis=-1, keepdims=True)
    var = jnp.mean(jnp.square(x - mean), axis=-1, keepdims=True)
    xn = (x - mean) * jax.lax.rsqrt(var + 1e-5) * g_ref[...] + b_ref[...]
    h = (jnp.dot(xn.astype(jnp.bfloat16), fcw_ref[...],
                 preferred_element_type=jnp.float32) + fcb_ref[...])
    h = h * jax.nn.sigmoid(1.702 * h)          # QuickGELU (f32 elementwise)
    o_ref[...] = (x + jnp.dot(h.astype(jnp.bfloat16), pw_ref[...],
                              preferred_element_type=jnp.float32) + pb_ref[...])


def _attention_kernel(qkv_ref, o_ref, *, n_head, head_dim):
    """Causal multi-head attention for one batch element.

    qkv_ref: (1, L, 3D) fused QKV slab. Heads are sliced on the lane axis
    inside the kernel; the result is written back as one lane-dense (L, D)
    slab (single unmasked store, no HBM head transposes).
    """
    L = qkv_ref.shape[1]
    D = n_head * head_dim
    qkv = qkv_ref[0]                                       # (L, 3D) f32
    scale = 1.0 / float(head_dim) ** 0.5

    # Causal additive bias, built ONCE per grid step (hoisted out of head loop).
    row = jax.lax.broadcasted_iota(jnp.int32, (L, L), 0)
    col = jax.lax.broadcasted_iota(jnp.int32, (L, L), 1)
    causal_bias = jnp.where(col > row, jnp.float32(-1e30), jnp.float32(0.0))

    outs = []
    for h in range(n_head):                                 # static unroll
        lo = h * head_dim
        q = (qkv[:, lo:lo + head_dim] * scale).astype(jnp.bfloat16)
        k = qkv[:, D + lo:D + lo + head_dim].astype(jnp.bfloat16)
        v = qkv[:, 2 * D + lo:2 * D + lo + head_dim].astype(jnp.bfloat16)
        s = jnp.dot(q, k.T, preferred_element_type=jnp.float32) + causal_bias
        s = s - jnp.max(s, axis=-1, keepdims=True)
        p = jnp.exp(s)
        denom = jnp.sum(p, axis=-1, keepdims=True)
        o = jnp.dot(p.astype(jnp.bfloat16), v, preferred_element_type=jnp.float32)
        # divide once on the (L, hd) output via EUP reciprocal, not on (L, L)
        outs.append(o * pl.reciprocal(denom, approx=True))

    o_ref[0] = jnp.concatenate(outs, axis=-1)               # lane-dense (L, D)


def _ln_project_kernel(x_ref, g_ref, b_ref, w_ref, o_ref):
    """out = LayerNorm(x) @ W   (ln_final fused with text_projection)."""
    x = x_ref[...]
    mean = jnp.mean(x, axis=-1, keepdims=True)
    var = jnp.mean(jnp.square(x - mean), axis=-1, keepdims=True)
    xn = (x - mean) * jax.lax.rsqrt(var + 1e-5) * g_ref[...] + b_ref[...]
    o_ref[...] = jnp.dot(xn.astype(jnp.bfloat16), w_ref[...],
                         preferred_element_type=jnp.float32)


# ----------------------------- wrappers ---------------------------------------

def ln_linear(x, g, b, w, bias, *, tm_pref=256, tn_pref=512):
    M, K = x.shape
    Nout = w.shape[1]
    tm, tn = _tile_rows(M, tm_pref), _tile_lanes(Nout, tn_pref)
    return pl.pallas_call(
        _ln_linear_kernel,
        grid=(pl.cdiv(M, tm), pl.cdiv(Nout, tn)),
        in_specs=[pl.BlockSpec((tm, K), lambda i, j: (i, 0)),
                  pl.BlockSpec((1, K), lambda i, j: (0, 0)),
                  pl.BlockSpec((1, K), lambda i, j: (0, 0)),
                  pl.BlockSpec((K, tn), lambda i, j: (0, j)),
                  pl.BlockSpec((1, tn), lambda i, j: (0, j))],
        out_specs=pl.BlockSpec((tm, tn), lambda i, j: (i, j)),
        out_shape=jax.ShapeDtypeStruct((M, Nout), jnp.float32),
        compiler_params=pltpu.CompilerParams(
            dimension_semantics=("parallel", "parallel"),
            vmem_limit_bytes=VMEM_LIMIT),
    )(x, g.reshape(1, K), b.reshape(1, K), w, bias.reshape(1, Nout))


def linear_residual(h, w, bias, res, *, tm_pref=256, tn_pref=512):
    M, K = h.shape
    Nout = w.shape[1]
    tm, tn = _tile_rows(M, tm_pref), _tile_lanes(Nout, tn_pref)
    return pl.pallas_call(
        _linear_residual_kernel,
        grid=(pl.cdiv(M, tm), pl.cdiv(Nout, tn)),
        in_specs=[pl.BlockSpec((tm, K), lambda i, j: (i, 0)),
                  pl.BlockSpec((K, tn), lambda i, j: (0, j)),
                  pl.BlockSpec((1, tn), lambda i, j: (0, j)),
                  pl.BlockSpec((tm, tn), lambda i, j: (i, j))],
        out_specs=pl.BlockSpec((tm, tn), lambda i, j: (i, j)),
        out_shape=jax.ShapeDtypeStruct((M, Nout), jnp.float32),
        compiler_params=pltpu.CompilerParams(
            dimension_semantics=("parallel", "parallel"),
            vmem_limit_bytes=VMEM_LIMIT),
    )(h, w, bias.reshape(1, Nout), res)


def mlp_block(x, g, b, fc_w, fc_b, proj_w, proj_b, *, tm_pref=256):
    M, D = x.shape
    Dh = fc_w.shape[1]
    tm = _tile_rows(M, tm_pref)
    return pl.pallas_call(
        _mlp_block_kernel,
        grid=(pl.cdiv(M, tm),),
        in_specs=[pl.BlockSpec((tm, D), lambda i: (i, 0)),
                  pl.BlockSpec((1, D), lambda i: (0, 0)),
                  pl.BlockSpec((1, D), lambda i: (0, 0)),
                  pl.BlockSpec((D, Dh), lambda i: (0, 0)),
                  pl.BlockSpec((1, Dh), lambda i: (0, 0)),
                  pl.BlockSpec((Dh, D), lambda i: (0, 0)),
                  pl.BlockSpec((1, D), lambda i: (0, 0))],
        out_specs=pl.BlockSpec((tm, D), lambda i: (i, 0)),
        out_shape=jax.ShapeDtypeStruct((M, D), jnp.float32),
        compiler_params=pltpu.CompilerParams(
            dimension_semantics=("parallel",),
            vmem_limit_bytes=VMEM_LIMIT),
    )(x, g.reshape(1, D), b.reshape(1, D), fc_w, fc_b.reshape(1, Dh),
      proj_w, proj_b.reshape(1, D))


def attention(qkv, *, n_head):
    """qkv: (N, L, 3D) fused projections -> (N, L, D) attention output."""
    N, L, D3 = qkv.shape
    D = D3 // 3
    hd = D // n_head
    kern = functools.partial(_attention_kernel, n_head=n_head, head_dim=hd)
    return pl.pallas_call(
        kern,
        grid=(N,),
        in_specs=[pl.BlockSpec((1, L, D3), lambda i: (i, 0, 0))],
        out_specs=pl.BlockSpec((1, L, D), lambda i: (i, 0, 0)),
        out_shape=jax.ShapeDtypeStruct((N, L, D), jnp.float32),
        compiler_params=pltpu.CompilerParams(
            dimension_semantics=("parallel",),
            vmem_limit_bytes=VMEM_LIMIT),
    )(qkv)


def ln_project(x, g, b, w, *, tm_pref=256, tn_pref=512):
    M, K = x.shape
    Nout = w.shape[1]
    tm, tn = _tile_rows(M, tm_pref), _tile_lanes(Nout, tn_pref)
    return pl.pallas_call(
        _ln_project_kernel,
        grid=(pl.cdiv(M, tm), pl.cdiv(Nout, tn)),
        in_specs=[pl.BlockSpec((tm, K), lambda i, j: (i, 0)),
                  pl.BlockSpec((1, K), lambda i, j: (0, 0)),
                  pl.BlockSpec((1, K), lambda i, j: (0, 0)),
                  pl.BlockSpec((K, tn), lambda i, j: (0, j))],
        out_specs=pl.BlockSpec((tm, tn), lambda i, j: (i, j)),
        out_shape=jax.ShapeDtypeStruct((M, Nout), jnp.float32),
        compiler_params=pltpu.CompilerParams(
            dimension_semantics=("parallel", "parallel"),
            vmem_limit_bytes=VMEM_LIMIT),
    )(x, g.reshape(1, K), b.reshape(1, K), w)


# ----------------------------- model ------------------------------------------

def init_params(key, *, n_layers, d_model, n_head, embed_dim, ctx_len):
    keys = jax.random.split(key, 3 + n_layers)
    params = {
        "n_head": n_head,
        "positional_embedding": 0.01 * jax.random.normal(
            keys[0], (ctx_len, d_model), jnp.float32),
        "lnf_g": jnp.ones((d_model,), jnp.float32),
        "lnf_b": jnp.zeros((d_model,), jnp.float32),
        # matmul weights stored bf16 once (MXU-native, half the DMA bytes)
        "text_projection": (0.02 * jax.random.normal(
            keys[1], (d_model, embed_dim), jnp.float32)).astype(jnp.bfloat16),
        "blocks": [],
    }
    for li in range(n_layers):
        bk = jax.random.split(keys[3 + li], 4)
        params["blocks"].append({
            # weights stored as (in, out) == PyTorch weight.T, bf16
            "ln1_g": jnp.ones((d_model,), jnp.float32),
            "ln1_b": jnp.zeros((d_model,), jnp.float32),
            "in_w": (0.02 * jax.random.normal(
                bk[0], (d_model, 3 * d_model), jnp.float32)).astype(jnp.bfloat16),
            "in_b": jnp.zeros((3 * d_model,), jnp.float32),
            "out_w": (0.02 * jax.random.normal(
                bk[1], (d_model, d_model), jnp.float32)).astype(jnp.bfloat16),
            "out_b": jnp.zeros((d_model,), jnp.float32),
            "ln2_g": jnp.ones((d_model,), jnp.float32),
            "ln2_b": jnp.zeros((d_model,), jnp.float32),
            "fc_w": (0.02 * jax.random.normal(
                bk[2], (d_model, 4 * d_model), jnp.float32)).astype(jnp.bfloat16),
            "fc_b": jnp.zeros((4 * d_model,), jnp.float32),
            "proj_w": (0.02 * jax.random.normal(
                bk[3], (4 * d_model, d_model), jnp.float32)).astype(jnp.bfloat16),
            "proj_b": jnp.zeros((d_model,), jnp.float32),
        })
    return params


def text_encoder_forward(params, special_prompts, tokenized_prompts):
    """special_prompts: (N, L, D) float32, tokenized_prompts: (N, L) int32."""
    N, L, D = special_prompts.shape
    H = params["n_head"]

    # x = SpecialPrompts + positional_embedding   (glue: elementwise add)
    # (the PyTorch permute(1,0,2)/back is layout-only; computed directly in NLD)
    x = special_prompts + params["positional_embedding"][None, :, :]
    x2 = x.reshape(N * L, D)

    for blk in params["blocks"]:
        # x = x + out_proj(attn(ln_1(x)))
        qkv = ln_linear(x2, blk["ln1_g"], blk["ln1_b"],
                        blk["in_w"], blk["in_b"])                  # (N*L, 3D)
        attn = attention(qkv.reshape(N, L, 3 * D), n_head=H)        # (N, L, D)
        x2 = linear_residual(attn.reshape(N * L, D),
                             blk["out_w"], blk["out_b"], x2)        # fused +res
        # x = x + proj(QuickGELU(fc(ln_2(x))))  -- single fused MLP kernel
        x2 = mlp_block(x2, blk["ln2_g"], blk["ln2_b"],
                       blk["fc_w"], blk["fc_b"],
                       blk["proj_w"], blk["proj_b"])

    x = x2.reshape(N, L, D)
    # gather EOT rows FIRST, then ln_final + text_projection on (N, D) only
    eot = jnp.argmax(tokenized_prompts, axis=-1)                    # (N,)
    x_eot = x[jnp.arange(N), eot]                                   # (N, D) glue gather
    return ln_project(x_eot, params["lnf_g"], params["lnf_b"],
                      params["text_projection"])                    # (N, E)


# ----------------------------- driver ------------------------------------------

if __name__ == "__main__":
    N, L, D, H, LAYERS, E = 2, 8, 32, 4, 2, 16

    key = jax.random.PRNGKey(0)
    k_params, k_x, k_tok = jax.random.split(key, 3)

    params = init_params(k_params, n_layers=LAYERS, d_model=D, n_head=H,
                         embed_dim=E, ctx_len=L)

    special_prompts = jax.random.normal(k_x, (N, L, D), jnp.float32)
    tokenized_prompts = jax.random.randint(k_tok, (N, L), 1, 50, jnp.int32)
    # plant an EOT-like (max-id) token per sequence, as in CLIP tokenization
    tokenized_prompts = tokenized_prompts.at[0, 5].set(100)
    tokenized_prompts = tokenized_prompts.at[1, 3].set(100)

    out = text_encoder_forward(params, special_prompts, tokenized_prompts)
    out = jax.block_until_ready(out)
    assert out.shape == (N, E) and out.dtype == jnp.float32
    assert bool(jnp.all(jnp.isfinite(out)))
    print("KERNEL_OK")
</pallas_src>

<mosaic_0001>
module attributes {stable_mosaic.version = 11 : i64} {
  func.func @_ln_linear_kernel(%arg0: i32, %arg1: i32, %arg2: memref<16x32xf32, #tpu.memory_space<vmem>>, %arg3: memref<1x32xf32, #tpu.memory_space<vmem>>, %arg4: memref<1x32xf32, #tpu.memory_space<vmem>>, %arg5: memref<32x96xbf16, #tpu.memory_space<vmem>>, %arg6: memref<1x96xf32, #tpu.memory_space<vmem>>, %arg7: memref<16x96xf32, #tpu.memory_space<vmem>>) attributes {dimension_semantics = [#tpu.dimension_semantics<parallel>, #tpu.dimension_semantics<parallel>], iteration_bounds = array<i64: 1, 1>, scalar_prefetch = 0 : i64, scratch_operands = 0 : i64, tpu.core_type = #tpu.core_type<tc>, window_params = [{transform_indices = @transform_0, window_bounds = array<i64: 16, 32>}, {pipeline_mode = #tpu.pipeline_mode<synchronous>, transform_indices = @transform_1, window_bounds = array<i64: 1, 32>}, {pipeline_mode = #tpu.pipeline_mode<synchronous>, transform_indices = @transform_2, window_bounds = array<i64: 1, 32>}, {transform_indices = @transform_3, window_bounds = array<i64: 32, 96>}, {transform_indices = @transform_4, window_bounds = array<i64: 1, 96>}, {transform_indices = @transform_5, window_bounds = array<i64: 16, 96>}]} {
    %c0 = arith.constant 0 : index
    %c0_0 = arith.constant 0 : index
    %0 = vector.load %arg2[%c0, %c0_0] : memref<16x32xf32, #tpu.memory_space<vmem>>, vector<16x32xf32>
    %cst = arith.constant dense<0.000000e+00> : vector<16xf32>
    %1 = vector.multi_reduction <add>, %0, %cst [1] : vector<16x32xf32> to vector<16xf32>
    %2 = vector.shape_cast %1 : vector<16xf32> to vector<16x1xf32>
    %cst_1 = arith.constant 3.200000e+01 : f32
    %3 = vector.broadcast %cst_1 : f32 to vector<16x1xf32>
    %4 = arith.divf %2, %3 : vector<16x1xf32>
    %5 = vector.broadcast %4 : vector<16x1xf32> to vector<16x32xf32>
    %6 = arith.subf %0, %5 : vector<16x32xf32>
    %7 = arith.mulf %6, %6 : vector<16x32xf32>
    %cst_2 = arith.constant dense<0.000000e+00> : vector<16xf32>
    %8 = vector.multi_reduction <add>, %7, %cst_2 [1] : vector<16x32xf32> to vector<16xf32>
    %9 = vector.shape_cast %8 : vector<16xf32> to vector<16x1xf32>
    %cst_3 = arith.constant 3.200000e+01 : f32
    %10 = vector.broadcast %cst_3 : f32 to vector<16x1xf32>
    %11 = arith.divf %9, %10 : vector<16x1xf32>
    %12 = vector.broadcast %4 : vector<16x1xf32> to vector<16x32xf32>
    %13 = arith.subf %0, %12 : vector<16x32xf32>
    %cst_4 = arith.constant 9.99999974E-6 : f32
    %14 = vector.broadcast %cst_4 : f32 to vector<16x1xf32>
    %15 = arith.addf %11, %14 : vector<16x1xf32>
    %16 = math.rsqrt %15 : vector<16x1xf32>
    %17 = vector.broadcast %16 : vector<16x1xf32> to vector<16x32xf32>
    %18 = arith.mulf %13, %17 : vector<16x32xf32>
    %c0_5 = arith.constant 0 : index
    %c0_6 = arith.constant 0 : index
    %19 = vector.load %arg3[%c0_5, %c0_6] : memref<1x32xf32, #tpu.memory_space<vmem>>, vector<1x32xf32>
    %20 = vector.broadcast %19 : vector<1x32xf32> to vector<16x32xf32>
    %21 = arith.mulf %18, %20 : vector<16x32xf32>
    %c0_7 = arith.constant 0 : index
    %c0_8 = arith.constant 0 : index
    %22 = vector.load %arg4[%c0_7, %c0_8] : memref<1x32xf32, #tpu.memory_space<vmem>>, vector<1x32xf32>
    %23 = vector.broadcast %22 : vector<1x32xf32> to vector<16x32xf32>
    %24 = arith.addf %21, %23 : vector<16x32xf32>
    %25 = arith.truncf %24 : vector<16x32xf32> to vector<16x32xbf16>
    %c0_9 = arith.constant 0 : index
    %c0_10 = arith.constant 0 : index
    %26 = vector.load %arg5[%c0_9, %c0_10] : memref<32x96xbf16, #tpu.memory_space<vmem>>, vector<32x96xbf16>
    %cst_11 = arith.constant dense<0.000000e+00> : vector<16x96xf32>
    %27 = tpu.matmul %25, %26, %cst_11 {dimension_numbers = #tpu.dot_dimension_numbers<[1], [0], [0], [1], [0, 0, 1, 1], [], []>} : vector<16x32xbf16>, vector<32x96xbf16>, vector<16x96xf32> -> vector<16x96xf32>
    %c0_12 = arith.constant 0 : index
    %c0_13 = arith.constant 0 : index
    %28 = vector.load %arg6[%c0_12, %c0_13] : memref<1x96xf32, #tpu.memory_space<vmem>>, vector<1x96xf32>
    %29 = vector.broadcast %28 : vector<1x96xf32> to vector<16x96xf32>
    %30 = arith.addf %27, %29 : vector<16x96xf32>
    %c0_14 = arith.constant 0 : index
    %c0_15 = arith.constant 0 : index
    %31 = vector.load %arg7[%c0_14, %c0_15] : memref<16x96xf32, #tpu.memory_space<vmem>>, vector<16x96xf32>
    tpu.vector_store %arg7[%c0_14, %c0_15], %30 {strides = array<i32>} : memref<16x96xf32, #tpu.memory_space<vmem>>, vector<16x96xf32>,
    return
  }
  func.func @transform_0(%arg0: i32, %arg1: i32) -> (i32, i32) {
    %c0_i32 = arith.constant 0 : i32
    %c0_i32_0 = arith.constant 0 : i32
    return %arg0, %c0_i32 : i32, i32
  }
  func.func @transform_1(%arg0: i32, %arg1: i32) -> (i32, i32) {
    %c0_i32 = arith.constant 0 : i32
    %c0_i32_0 = arith.constant 0 : i32
    %c0_i32_1 = arith.constant 0 : i32
    return %c0_i32, %c0_i32_0 : i32, i32
  }
  func.func @transform_2(%arg0: i32, %arg1: i32) -> (i32, i32) {
    %c0_i32 = arith.constant 0 : i32
    %c0_i32_0 = arith.constant 0 : i32
    %c0_i32_1 = arith.constant 0 : i32
    return %c0_i32, %c0_i32_0 : i32, i32
  }
  func.func @transform_3(%arg0: i32, %arg1: i32) -> (i32, i32) {
    %c0_i32 = arith.constant 0 : i32
    %c0_i32_0 = arith.constant 0 : i32
    return %c0_i32, %arg1 : i32, i32
  }
  func.func @transform_4(%arg0: i32, %arg1: i32) -> (i32, i32) {
    %c0_i32 = arith.constant 0 : i32
    %c0_i32_0 = arith.constant 0 : i32
    return %c0_i32, %arg1 : i32, i32
  }
  func.func @transform_5(%arg0: i32, %arg1: i32) -> (i32, i32) {
    %c0_i32 = arith.constant 0 : i32
    return %arg0, %arg1 : i32, i32
  }
}

</mosaic_0001>

<bundles_post_ra>
// kernel: tpu_custom_call.1
= control target key start
LH: loop header
LB: loop body
LE: loop exit
PB: predicated region body
PF: predicated region fallthrough
CT: control target
= control target key end

     0   :  { %10 = vsyncpa [#allocation3], 0  ;;  %s393_s0 = inlined_call_operand.hbm [shape: f32[16,32], index: 0, kind: input, shape index: {}]   ;;  %s394_s1 = inlined_call_operand.hbm [shape: f32[1,32], index: 1, kind: input, shape index: {}]   ;;  %s395_s2 = inlined_call_operand.vmem [shape: f32[1,32], index: 2, kind: input, shape index: {}]   ;;  %s396_s3 = inlined_call_operand.hbm [shape: bf16[32,96], index: 3, kind: input, shape index: {}]   ;;  %s397_s4 = inlined_call_operand.vmem [shape: f32[1,96], index: 4, kind: input, shape index: {}]   ;;  %s398_s5 = inlined_call_operand.hbm [shape: f32[16,96], index: 5, kind: output, shape index: {}]  }
   0x1   :  { %11 = vsyncpa [#allocation6], 0  ;;  %s31_s20 = sshll.u32 %s394_s1, 4  ;;  %s32_s20 = int_to_ptr.hbm [resolvable:$true] %s31_s20 }
   0x2   :  { %12 = vsyncpa [#allocation4], 0  ;;  %s325_s21 = smov [#allocation5]   ;;  %s17_s25 = sshll.u32 %s393_s0, 4  ;;  %s18_s25 = int_to_ptr.hbm [resolvable:$true] %s17_s25 }
   0x3   :  { %s33_s22 = sshll.u32 %s325_s21, 4  ;;  %s326_s26 = smov [#allocation2]   ;;  %s34_s22 = int_to_ptr.vmem [resolvable:$true] %s33_s22 }
   0x4   :  { %36 = dma.hbm_to_vmem [thread:$0]  %s32_s20, 16, %s34_s22, [#allocation6]  }
   0x5   :  { %s19_s27 = sshll.u32 %s326_s26, 4  ;;  %s327_s28 = smov 128   ;;  %s20_s27 = int_to_ptr.vmem [resolvable:$true] %s19_s27 }
   0x6   :  { %s328_s29 = smov 8   ;;  %s43_s6 = sshll.u32 %s396_s3, 4  ;;  %s44_s6 = int_to_ptr.hbm [resolvable:$true] %s43_s6 }
   0x7   :  { %25 = dma.hbm_to_vmem [thread:$0]  %s18_s25, 256, %s20_s27, [#allocation3], %s327_s28, %s327_s28, %s328_s29  }
   0x8   :  { %s329_s7 = smov [#allocation7]   ;;  %s330_s0 = smov 64  }
   0x9   :  { %s45_s8 = sshll.u32 %s329_s7, 4  ;;  %s331_s9 = smov 4   ;;  %s46_s8 = int_to_ptr.vmem [resolvable:$true] %s45_s8 }
   0xa   :  { %51 = dma.hbm_to_vmem [thread:$0]  %s44_s6, 256, %s46_s8, [#allocation6], %s330_s0, %s330_s0, %s331_s9  }
   0xb   :  { %319 = dma.done.wait [#allocation3], 256  }
   0xc   :  { %320 = vsyncadd [#allocation3], 4294967040 }
   0xd   :  { %321 = dma.done.wait [#allocation6], 272  }
   0xe   :  { %322 = vsyncadd [#allocation6], 4294967024  ;;  %vm69_vm0 = vcmask 261120   ;;  %v67_v0 = vld [vmem:[#allocation2] sm:$0xff]  ;;  %v68_v2 = vld [vmem:[#allocation2 + $0x8] sm:$0xff]  ;;  %v332_v4 = vmov 32.0  }
   0xf   :  { %v70_v1 = vsel %vm69_vm0, %v67_v0, 0.0  ;;  %v73_v3 = vsel %vm69_vm0, %v68_v2, 0.0  ;;  %217 = vrcp.f32 %v332_v4  ;;  %v204_v21 = vld [vmem:[#allocation7 + $0x8] sm:$0xff]  ;;  %v203_v23 = vld [vmem:[#allocation7] sm:$0xff]  ;;  %v214_v42 = vld [vmem:[#allocation5] ss:$0 sm:$0xff] }
  0x10   :  { %71 = vadd.xlane.f32.xlu0 %v70_v1  ;;  %163 = vmatpush.bf16.msra.mxu0 %v204_v21  ;;  %v215_v47 = vld [vmem:[%s395_s2] ss:$0 sm:$0xff]  ;;  %vm171_vm8 = vcmask 785408   ;;  %s333_s13 = smov [#allocation8]   ;;  %s180_s2 = sshll.u32 %s398_s5, 4  ;;  %s181_s2 = int_to_ptr.hbm [resolvable:$true] %s180_s2 }
  0x11   :  { %v216_v52 = vld [vmem:[%s397_s4] ss:$0 sm:$0xff]  ;;  %s178_s14 = sshll.u32 %s333_s13, 4  ;;  %s179_s14 = int_to_ptr.vmem [resolvable:$true] %s178_s14 }
  0x14   :  { %164 = vmatpush.bf16.msra.mxu0 %v203_v23 }
  0x15   :  { %v218_v5 = vpop.eup %217 }
  0x16   :  { %v77_v6 = vmul.f32 32.0, %v218_v5  ;;  %vm81_vm1 = vweird.f32 %v218_v5 }
  0x18   :  { %74 = vadd.xlane.f32.xlu0 %v73_v3  ;;  %v78_v7 = vsub.f32 1.0, %v77_v6 }
  0x1a   :  { %v79_v8 = vmul.f32 %v218_v5, %v78_v7 }
  0x1c   :  { %v80_v9 = vadd.f32 %v218_v5, %v79_v8 }
  0x1e   :  { %v82_v10 = vsel %vm81_vm1, %v218_v5, %v80_v9 }
  0x83   :  { %v72_v11 = vpop.xlane.xlu0 %71 }
  0x84   :  { %v83_v12 = vmul.f32 %v82_v10, %v72_v11 }
  0x86   :  { %v85_v13 = vsub.f32 %v67_v0, %v83_v12 }
  0x88   :  { %v87_v14 = vmul.f32 %v85_v13, %v85_v13 }
  0x8a   :  { %v89_v15 = vsel %vm69_vm0, %v87_v14, 0.0 }
  0x8b   :  { %90 = vadd.xlane.f32.xlu1 %v89_v15  ;;  %v75_v16 = vpop.xlane.xlu0 %74 }
  0x8c   :  { %v84_v17 = vmul.f32 %v82_v10, %v75_v16 }
  0x8e   :  { %v86_v18 = vsub.f32 %v68_v2, %v84_v17 }
  0x90   :  { %v88_v19 = vmul.f32 %v86_v18, %v86_v18 }
  0x92   :  { %v92_v20 = vsel %vm69_vm0, %v88_v19, 0.0 }
  0x93   :  { %93 = vadd.xlane.f32.xlu1 %v92_v20 }
  0xfe   :  { %v91_v22 = vpop.xlane.xlu1 %90 }
  0xff   :  { %v95_v24 = vmul.f32 %v91_v22, %v82_v10 }
 0x101   :  { %v97_v25 = vadd.f32 1e-05, %v95_v24 }
 0x103   :  { %219 = vrsqrt.f32 %v97_v25  ;;  %vm105_vm3 = vweird.f32 %v97_v25 }
 0x106   :  { %v94_v26 = vpop.xlane.xlu1 %93 }
 0x107   :  { %v96_v27 = vmul.f32 %v94_v26, %v82_v10 }
 0x109   :  { %v220_v28 = vpop.eup %219  ;;  %v98_v29 = vadd.f32 1e-05, %v96_v27 }
 0x10a   :  { %v100_v30 = vmul.f32 %v220_v28, %v97_v25  ;;  %vm106_vm2 = vweird.f32 %v220_v28 }
 0x10b   :  { %221 = vrsqrt.f32 %v98_v29  ;;  %vm107_vm4 = vmor %vm105_vm3, %vm106_vm2  ;;  %vm115_vm6 = vweird.f32 %v98_v29 }
 0x10c   :  { %v101_v31 = vmul.f32 %v220_v28, %v100_v30 }
 0x10e   :  { %v102_v32 = vmul.f32 0.5, %v101_v31 }
 0x110   :  { %v103_v33 = vsub.f32 1.5, %v102_v32 }
 0x111   :  { %v222_v34 = vpop.eup %221 }
 0x112   :  { %v104_v35 = vmul.f32 %v220_v28, %v103_v33  ;;  %v110_v36 = vmul.f32 %v222_v34, %v98_v29  ;;  %vm116_vm5 = vweird.f32 %v222_v34 }
 0x113   :  { %vm117_vm7 = vmor %vm115_vm6, %vm116_vm5 }
 0x114   :  { %v111_v37 = vmul.f32 %v222_v34, %v110_v36  ;;  %v108_v38 = vsel %vm107_vm4, %v220_v28, %v104_v35 }
 0x115   :  { %v119_v41 = vmul.f32 %v108_v38, %v85_v13 }
 0x116   :  { %v112_v39 = vmul.f32 0.5, %v111_v37 }
 0x117   :  { %v125_v46 = vmul.f32 %v214_v42, %v119_v41 }
 0x118   :  { %v113_v40 = vsub.f32 1.5, %v112_v39 }
 0x119   :  { %v131_v49 = vadd.f32 %v215_v47, %v125_v46 }
 0x11a   :  { %v114_v43 = vmul.f32 %v222_v34, %v113_v40 }
 0x11c   :  { %v118_v44 = vsel %vm117_vm7, %v222_v34, %v114_v43 }
 0x11d   :  { %v120_v45 = vmul.f32 %v118_v44, %v86_v18 }
 0x11f   :  { %v126_v48 = vmul.f32 %v214_v42, %v120_v45 }
 0x121   :  { %v132_v50 = vadd.f32 %v215_v47, %v126_v48 }
 0x123   :  { %v133_v51 = vpack.c.bf16 %v132_v50, %v131_v49 }
 0x125   :  { %202 = vmatmul.msk.bf16.vlgmr.msra.gmra.mxu0 %vm69_vm0, %v133_v51 }
 0x1a2   :  { %v166_v53 = vpop.f32.mrf.mxu0 }
 0x1a3   :  { %v167_v54 = vadd.f32 %v216_v52, %v166_v53 }
 0x1a5   :  { %172 = vst.msk [vmem:[#allocation8] sm:$0xff] %vm171_vm8, %v167_v54 }
 0x1aa   :  { %v168_v55 = vpop.f32.mrf.mxu0 }
 0x1ab   :  { %v169_v56 = vadd.f32 %v216_v52, %v168_v55 }
 0x1ad   :  { %173 = vst.msk [vmem:[#allocation8 + $0x8] sm:$0xff] %vm171_vm8, %v169_v56 }
 0x1ae   :  { %186 = dma.vmem_to_hbm [thread:$0]  %s179_s14, 256, %s181_s2, [#allocation4], %s327_s28, %s327_s28, %s328_s29  }
 0x1af   :  { %323 = dma.done.wait [#allocation4], 256  }
 0x1b0   :  { %324 = vsyncadd [#allocation4], 4294967040 }
 0x1b1   :  { %191 = vsyncpa [#allocation3], 1 }
 0x1b2   :  { %192 = vsyncpa [#allocation6], 1 }
 0x1b3   :  { %193 = vsyncpa [#allocation4], 1 }

</bundles_post_ra>
